<compile_context>
chip_gen: v7x
topology: tpu7x:2x2x1
jax: 0.10.0
libtpu: 0.0.40
codegen_flags: <defaults>
</compile_context>

<pallas_src>
import math
from functools import partial

import jax
import jax.numpy as jnp
from jax.experimental import pallas as pl
from jax.experimental.pallas import tpu as pltpu


# ----------------------------- Fused MHA kernel ------------------------------
def mha_kernel(q_ref, k_ref, v_ref,
               wq_ref, bq_ref, wk_ref, bk_ref, wv_ref, bv_ref,
               wo_ref, bo_ref,
               o_ref, ctx_ref, *, h):
    """Fused multi-head attention for one batch element (one grid step)."""
    xq = q_ref[0]          # (S_q, D)
    xk = k_ref[0]          # (S_k, D)
    xv = v_ref[0]          # (S_k, D)
    d = xq.shape[-1]
    d_k = d // h
    scale = 1.0 / math.sqrt(d_k)

    # Projections on the MXU with f32 accumulation; results stay in VMEM/vregs.
    q_proj = jnp.dot(xq, wq_ref[...], preferred_element_type=jnp.float32) + bq_ref[...]
    k_proj = jnp.dot(xk, wk_ref[...], preferred_element_type=jnp.float32) + bk_ref[...]
    v_proj = jnp.dot(xv, wv_ref[...], preferred_element_type=jnp.float32) + bv_ref[...]

    # Fold 1/sqrt(d_k) into Q (d_k columns) rather than the (S_q, S_k) scores.
    q_proj = q_proj * scale

    # Head split via static column slices — no HBM transposes.
    for head in range(h):
        lo = head * d_k
        qh = q_proj[:, lo:lo + d_k]            # (S_q, d_k)
        kh = k_proj[:, lo:lo + d_k]            # (S_k, d_k)
        vh = v_proj[:, lo:lo + d_k]            # (S_k, d_k)

        # q @ k^T without materializing k.T: contract both last dims.
        s = jax.lax.dot_general(qh, kh, (((1,), (1,)), ((), ())),
                                preferred_element_type=jnp.float32)   # (S_q, S_k)

        # Reference's masked_fill is non-in-place & discarded -> mask ignored.
        m = jnp.max(s, axis=-1, keepdims=True)
        p = jnp.exp(s - m)
        denom = jnp.sum(p, axis=-1, keepdims=True)
        p = p * pl.reciprocal(denom, approx=True)        # EUP divide (free slot)

        # Dropout on p is identity (eval mode).
        ctx_ref[:, lo:lo + d_k] = jnp.dot(p, vh, preferred_element_type=jnp.float32)

    out = jnp.dot(ctx_ref[...], wo_ref[...], preferred_element_type=jnp.float32) + bo_ref[...]
    o_ref[0] = out.astype(o_ref.dtype)


def multi_head_attention(q, k, v, mask, params, h):
    """Matches MultiHeadAttention.forward(q, k, v, mask). Mask is ignored
    (faithful to the reference's non-in-place masked_fill)."""
    del mask
    b, s_q, d = q.shape
    s_k = k.shape[1]

    batch_map = lambda i: (i, 0, 0)
    rep_map = lambda i: (0, 0)
    weight_spec = pl.BlockSpec((d, d), rep_map)
    bias_spec = pl.BlockSpec((1, d), rep_map)

    return pl.pallas_call(
        partial(mha_kernel, h=h),
        out_shape=jax.ShapeDtypeStruct((b, s_q, d), q.dtype),
        grid=(b,),
        in_specs=[
            pl.BlockSpec((1, s_q, d), batch_map),   # q
            pl.BlockSpec((1, s_k, d), batch_map),   # k
            pl.BlockSpec((1, s_k, d), batch_map),   # v
            weight_spec, bias_spec,                 # wq, bq
            weight_spec, bias_spec,                 # wk, bk
            weight_spec, bias_spec,                 # wv, bv
            weight_spec, bias_spec,                 # wo, bo
        ],
        out_specs=pl.BlockSpec((1, s_q, d), batch_map),
        scratch_shapes=[pltpu.VMEM((s_q, d), jnp.float32)],   # per-head context slab
        compiler_params=pltpu.CompilerParams(
            dimension_semantics=("parallel",)),     # shard batch across TCs (v7x)
    )(q, k, v,
      params["wq"], params["bq"],
      params["wk"], params["bk"],
      params["wv"], params["bv"],
      params["wo"], params["bo"])


# ------------------------------ Pure-JAX reference ----------------------------
def mha_reference(q, k, v, params, h):
    b, s_q, d = q.shape
    s_k = k.shape[1]
    d_k = d // h
    Q = q @ params["wq"] + params["bq"][0]
    K = k @ params["wk"] + params["bk"][0]
    V = v @ params["wv"] + params["bv"][0]
    Q = Q.reshape(b, s_q, h, d_k).transpose(0, 2, 1, 3)
    K = K.reshape(b, s_k, h, d_k).transpose(0, 2, 1, 3)
    V = V.reshape(b, s_k, h, d_k).transpose(0, 2, 1, 3)
    s = jnp.einsum("bhqd,bhkd->bhqk", Q, K) / math.sqrt(d_k)
    p = jax.nn.softmax(s, axis=-1)
    ctx = jnp.einsum("bhqk,bhkd->bhqd", p, V)
    ctx = ctx.transpose(0, 2, 1, 3).reshape(b, s_q, d)
    return ctx @ params["wo"] + params["bo"][0]


# ---------------------------------- Params ------------------------------------
def init_params(key, d_model, scale=0.02):
    ks = jax.random.split(key, 8)

    def lin(kw, kb):
        w = scale * jax.random.normal(kw, (d_model, d_model), jnp.float32)
        b = scale * jax.random.normal(kb, (1, d_model), jnp.float32)
        return w, b

    wq, bq = lin(ks[0], ks[1])
    wk, bk = lin(ks[2], ks[3])
    wv, bv = lin(ks[4], ks[5])
    wo, bo = lin(ks[6], ks[7])
    return dict(wq=wq, bq=bq, wk=wk, bk=bk, wv=wv, bv=bv, wo=wo, bo=bo)


# ----------------------------------- Main --------------------------------------
if __name__ == "__main__":
    B, S_Q, S_KV, D_MODEL, H = 2, 8, 16, 32, 4

    root = jax.random.PRNGKey(0)
    kq, kk, kv, kp = jax.random.split(root, 4)

    q = jax.random.normal(kq, (B, S_Q, D_MODEL), jnp.float32)
    k = jax.random.normal(kk, (B, S_KV, D_MODEL), jnp.float32)
    v = jax.random.normal(kv, (B, S_KV, D_MODEL), jnp.float32)
    mask = jnp.ones((B, 1, S_Q, S_KV), jnp.float32)   # ignored (reference bug)

    params = init_params(kp, D_MODEL)

    out = multi_head_attention(q, k, v, mask, params, H)
    jax.block_until_ready(out)
    assert out.shape == (B, S_Q, D_MODEL) and out.dtype == jnp.float32

    ref = mha_reference(q, k, v, params, H)
    assert jnp.allclose(out, ref, atol=2e-2, rtol=2e-2), \
        f"max abs err {float(jnp.max(jnp.abs(out - ref)))}"
    print("KERNEL_OK")
</pallas_src>

<mosaic_0001>
module attributes {stable_mosaic.version = 11 : i64} {
  func.func @mha_kernel(%arg0: i32, %arg1: memref<1x8x32xf32, #tpu.memory_space<vmem>>, %arg2: memref<1x16x32xf32, #tpu.memory_space<vmem>>, %arg3: memref<1x16x32xf32, #tpu.memory_space<vmem>>, %arg4: memref<32x32xf32, #tpu.memory_space<vmem>>, %arg5: memref<1x32xf32, #tpu.memory_space<vmem>>, %arg6: memref<32x32xf32, #tpu.memory_space<vmem>>, %arg7: memref<1x32xf32, #tpu.memory_space<vmem>>, %arg8: memref<32x32xf32, #tpu.memory_space<vmem>>, %arg9: memref<1x32xf32, #tpu.memory_space<vmem>>, %arg10: memref<32x32xf32, #tpu.memory_space<vmem>>, %arg11: memref<1x32xf32, #tpu.memory_space<vmem>>, %arg12: memref<1x8x32xf32, #tpu.memory_space<vmem>>, %arg13: memref<8x32xf32, #tpu.memory_space<vmem>>) attributes {dimension_semantics = [#tpu.dimension_semantics<parallel>], iteration_bounds = array<i64: 2>, scalar_prefetch = 0 : i64, scratch_operands = 1 : i64, tpu.core_type = #tpu.core_type<tc>, window_params = [{transform_indices = @transform_0, window_bounds = array<i64: 1, 8, 32>}, {transform_indices = @transform_1, window_bounds = array<i64: 1, 16, 32>}, {transform_indices = @transform_2, window_bounds = array<i64: 1, 16, 32>}, {pipeline_mode = #tpu.pipeline_mode<synchronous>, transform_indices = @transform_3, window_bounds = array<i64: 32, 32>}, {pipeline_mode = #tpu.pipeline_mode<synchronous>, transform_indices = @transform_4, window_bounds = array<i64: 1, 32>}, {pipeline_mode = #tpu.pipeline_mode<synchronous>, transform_indices = @transform_5, window_bounds = array<i64: 32, 32>}, {pipeline_mode = #tpu.pipeline_mode<synchronous>, transform_indices = @transform_6, window_bounds = array<i64: 1, 32>}, {pipeline_mode = #tpu.pipeline_mode<synchronous>, transform_indices = @transform_7, window_bounds = array<i64: 32, 32>}, {pipeline_mode = #tpu.pipeline_mode<synchronous>, transform_indices = @transform_8, window_bounds = array<i64: 1, 32>}, {pipeline_mode = #tpu.pipeline_mode<synchronous>, transform_indices = @transform_9, window_bounds = array<i64: 32, 32>}, {pipeline_mode = #tpu.pipeline_mode<synchronous>, transform_indices = @transform_10, window_bounds = array<i64: 1, 32>}, {transform_indices = @transform_11, window_bounds = array<i64: 1, 8, 32>}]} {
    %c0 = arith.constant 0 : index
    %c0_0 = arith.constant 0 : index
    %c0_1 = arith.constant 0 : index
    %0 = vector.load %arg1[%c0, %c0_0, %c0_1] : memref<1x8x32xf32, #tpu.memory_space<vmem>>, vector<1x8x32xf32>
    %1 = vector.shape_cast %0 : vector<1x8x32xf32> to vector<8x32xf32>
    %c0_2 = arith.constant 0 : index
    %c0_3 = arith.constant 0 : index
    %c0_4 = arith.constant 0 : index
    %2 = vector.load %arg2[%c0_2, %c0_3, %c0_4] : memref<1x16x32xf32, #tpu.memory_space<vmem>>, vector<1x16x32xf32>
    %3 = vector.shape_cast %2 : vector<1x16x32xf32> to vector<16x32xf32>
    %c0_5 = arith.constant 0 : index
    %c0_6 = arith.constant 0 : index
    %c0_7 = arith.constant 0 : index
    %4 = vector.load %arg3[%c0_5, %c0_6, %c0_7] : memref<1x16x32xf32, #tpu.memory_space<vmem>>, vector<1x16x32xf32>
    %5 = vector.shape_cast %4 : vector<1x16x32xf32> to vector<16x32xf32>
    %c0_8 = arith.constant 0 : index
    %c0_9 = arith.constant 0 : index
    %6 = vector.load %arg4[%c0_8, %c0_9] : memref<32x32xf32, #tpu.memory_space<vmem>>, vector<32x32xf32>
    %cst = arith.constant dense<0.000000e+00> : vector<8x32xf32>
    %7 = tpu.matmul %1, %6, %cst {dimension_numbers = #tpu.dot_dimension_numbers<[1], [0], [0], [1], [0, 0, 1, 1], [], []>} : vector<8x32xf32>, vector<32x32xf32>, vector<8x32xf32> -> vector<8x32xf32>
    %c0_10 = arith.constant 0 : index
    %c0_11 = arith.constant 0 : index
    %8 = vector.load %arg5[%c0_10, %c0_11] : memref<1x32xf32, #tpu.memory_space<vmem>>, vector<1x32xf32>
    %9 = vector.broadcast %8 : vector<1x32xf32> to vector<8x32xf32>
    %10 = arith.addf %7, %9 : vector<8x32xf32>
    %c0_12 = arith.constant 0 : index
    %c0_13 = arith.constant 0 : index
    %11 = vector.load %arg6[%c0_12, %c0_13] : memref<32x32xf32, #tpu.memory_space<vmem>>, vector<32x32xf32>
    %cst_14 = arith.constant dense<0.000000e+00> : vector<16x32xf32>
    %12 = tpu.matmul %3, %11, %cst_14 {dimension_numbers = #tpu.dot_dimension_numbers<[1], [0], [0], [1], [0, 0, 1, 1], [], []>} : vector<16x32xf32>, vector<32x32xf32>, vector<16x32xf32> -> vector<16x32xf32>
    %c0_15 = arith.constant 0 : index
    %c0_16 = arith.constant 0 : index
    %13 = vector.load %arg7[%c0_15, %c0_16] : memref<1x32xf32, #tpu.memory_space<vmem>>, vector<1x32xf32>
    %14 = vector.broadcast %13 : vector<1x32xf32> to vector<16x32xf32>
    %15 = arith.addf %12, %14 : vector<16x32xf32>
    %c0_17 = arith.constant 0 : index
    %c0_18 = arith.constant 0 : index
    %16 = vector.load %arg8[%c0_17, %c0_18] : memref<32x32xf32, #tpu.memory_space<vmem>>, vector<32x32xf32>
    %cst_19 = arith.constant dense<0.000000e+00> : vector<16x32xf32>
    %17 = tpu.matmul %5, %16, %cst_19 {dimension_numbers = #tpu.dot_dimension_numbers<[1], [0], [0], [1], [0, 0, 1, 1], [], []>} : vector<16x32xf32>, vector<32x32xf32>, vector<16x32xf32> -> vector<16x32xf32>
    %c0_20 = arith.constant 0 : index
    %c0_21 = arith.constant 0 : index
    %18 = vector.load %arg9[%c0_20, %c0_21] : memref<1x32xf32, #tpu.memory_space<vmem>>, vector<1x32xf32>
    %19 = vector.broadcast %18 : vector<1x32xf32> to vector<16x32xf32>
    %20 = arith.addf %17, %19 : vector<16x32xf32>
    %cst_22 = arith.constant 0.353553385 : f32
    %21 = vector.broadcast %cst_22 : f32 to vector<8x32xf32>
    %22 = arith.mulf %10, %21 : vector<8x32xf32>
    %23 = vector.extract_strided_slice %22 {offsets = [0, 0], sizes = [8, 8], strides = [1, 1]} : vector<8x32xf32> to vector<8x8xf32>
    %24 = vector.extract_strided_slice %15 {offsets = [0, 0], sizes = [16, 8], strides = [1, 1]} : vector<16x32xf32> to vector<16x8xf32>
    %25 = vector.extract_strided_slice %20 {offsets = [0, 0], sizes = [16, 8], strides = [1, 1]} : vector<16x32xf32> to vector<16x8xf32>
    %cst_23 = arith.constant dense<0.000000e+00> : vector<8x16xf32>
    %26 = tpu.matmul %23, %24, %cst_23 {dimension_numbers = #tpu.dot_dimension_numbers<[1], [1], [0], [0], [0, 0, 1, 0], [], []>} : vector<8x8xf32>, vector<16x8xf32>, vector<8x16xf32> -> vector<8x16xf32>
    %cst_24 = arith.constant dense<0xFF800000> : vector<8xf32>
    %27 = vector.multi_reduction <maximumf>, %26, %cst_24 [1] : vector<8x16xf32> to vector<8xf32>
    %28 = vector.shape_cast %27 : vector<8xf32> to vector<8x1xf32>
    %29 = vector.broadcast %28 : vector<8x1xf32> to vector<8x16xf32>
    %30 = arith.subf %26, %29 : vector<8x16xf32>
    %31 = math.exp %30 : vector<8x16xf32>
    %cst_25 = arith.constant dense<0.000000e+00> : vector<8xf32>
    %32 = vector.multi_reduction <add>, %31, %cst_25 [1] : vector<8x16xf32> to vector<8xf32>
    %33 = vector.shape_cast %32 : vector<8xf32> to vector<8x1xf32>
    %34 = tpu.reciprocal %33 {approx = true} : vector<8x1xf32> -> vector<8x1xf32>
    %35 = vector.broadcast %34 : vector<8x1xf32> to vector<8x16xf32>
    %36 = arith.mulf %31, %35 : vector<8x16xf32>
    %cst_26 = arith.constant dense<0.000000e+00> : vector<8x8xf32>
    %37 = tpu.matmul %36, %25, %cst_26 {dimension_numbers = #tpu.dot_dimension_numbers<[1], [0], [0], [1], [0, 0, 1, 1], [], []>} : vector<8x16xf32>, vector<16x8xf32>, vector<8x8xf32> -> vector<8x8xf32>
    %c0_27 = arith.constant 0 : index
    %c0_28 = arith.constant 0 : index
    %38 = vector.load %arg13[%c0_27, %c0_28] : memref<8x32xf32, #tpu.memory_space<vmem>>, vector<8x8xf32>
    tpu.vector_store %arg13[%c0_27, %c0_28], %37 {strides = array<i32>} : memref<8x32xf32, #tpu.memory_space<vmem>>, vector<8x8xf32>,
    %39 = vector.extract_strided_slice %22 {offsets = [0, 8], sizes = [8, 8], strides = [1, 1]} : vector<8x32xf32> to vector<8x8xf32>
    %40 = vector.extract_strided_slice %15 {offsets = [0, 8], sizes = [16, 8], strides = [1, 1]} : vector<16x32xf32> to vector<16x8xf32>
    %41 = vector.extract_strided_slice %20 {offsets = [0, 8], sizes = [16, 8], strides = [1, 1]} : vector<16x32xf32> to vector<16x8xf32>
    %cst_29 = arith.constant dense<0.000000e+00> : vector<8x16xf32>
    %42 = tpu.matmul %39, %40, %cst_29 {dimension_numbers = #tpu.dot_dimension_numbers<[1], [1], [0], [0], [0, 0, 1, 0], [], []>} : vector<8x8xf32>, vector<16x8xf32>, vector<8x16xf32> -> vector<8x16xf32>
    %cst_30 = arith.constant dense<0xFF800000> : vector<8xf32>
    %43 = vector.multi_reduction <maximumf>, %42, %cst_30 [1] : vector<8x16xf32> to vector<8xf32>
    %44 = vector.shape_cast %43 : vector<8xf32> to vector<8x1xf32>
    %45 = vector.broadcast %44 : vector<8x1xf32> to vector<8x16xf32>
    %46 = arith.subf %42, %45 : vector<8x16xf32>
    %47 = math.exp %46 : vector<8x16xf32>
    %cst_31 = arith.constant dense<0.000000e+00> : vector<8xf32>
    %48 = vector.multi_reduction <add>, %47, %cst_31 [1] : vector<8x16xf32> to vector<8xf32>
    %49 = vector.shape_cast %48 : vector<8xf32> to vector<8x1xf32>
    %50 = tpu.reciprocal %49 {approx = true} : vector<8x1xf32> -> vector<8x1xf32>
    %51 = vector.broadcast %50 : vector<8x1xf32> to vector<8x16xf32>
    %52 = arith.mulf %47, %51 : vector<8x16xf32>
    %cst_32 = arith.constant dense<0.000000e+00> : vector<8x8xf32>
    %53 = tpu.matmul %52, %41, %cst_32 {dimension_numbers = #tpu.dot_dimension_numbers<[1], [0], [0], [1], [0, 0, 1, 1], [], []>} : vector<8x16xf32>, vector<16x8xf32>, vector<8x8xf32> -> vector<8x8xf32>
    %c0_33 = arith.constant 0 : index
    %c8 = arith.constant 8 : index
    %54 = vector.load %arg13[%c0_33, %c8] : memref<8x32xf32, #tpu.memory_space<vmem>>, vector<8x8xf32>
    tpu.vector_store %arg13[%c0_33, %c8], %53 {strides = array<i32>} : memref<8x32xf32, #tpu.memory_space<vmem>>, vector<8x8xf32>,
    %55 = vector.extract_strided_slice %22 {offsets = [0, 16], sizes = [8, 8], strides = [1, 1]} : vector<8x32xf32> to vector<8x8xf32>
    %56 = vector.extract_strided_slice %15 {offsets = [0, 16], sizes = [16, 8], strides = [1, 1]} : vector<16x32xf32> to vector<16x8xf32>
    %57 = vector.extract_strided_slice %20 {offsets = [0, 16], sizes = [16, 8], strides = [1, 1]} : vector<16x32xf32> to vector<16x8xf32>
    %cst_34 = arith.constant dense<0.000000e+00> : vector<8x16xf32>
    %58 = tpu.matmul %55, %56, %cst_34 {dimension_numbers = #tpu.dot_dimension_numbers<[1], [1], [0], [0], [0, 0, 1, 0], [], []>} : vector<8x8xf32>, vector<16x8xf32>, vector<8x16xf32> -> vector<8x16xf32>
    %cst_35 = arith.constant dense<0xFF800000> : vector<8xf32>
    %59 = vector.multi_reduction <maximumf>, %58, %cst_35 [1] : vector<8x16xf32> to vector<8xf32>
    %60 = vector.shape_cast %59 : vector<8xf32> to vector<8x1xf32>
    %61 = vector.broadcast %60 : vector<8x1xf32> to vector<8x16xf32>
    %62 = arith.subf %58, %61 : vector<8x16xf32>
    %63 = math.exp %62 : vector<8x16xf32>
    %cst_36 = arith.constant dense<0.000000e+00> : vector<8xf32>
    %64 = vector.multi_reduction <add>, %63, %cst_36 [1] : vector<8x16xf32> to vector<8xf32>
    %65 = vector.shape_cast %64 : vector<8xf32> to vector<8x1xf32>
    %66 = tpu.reciprocal %65 {approx = true} : vector<8x1xf32> -> vector<8x1xf32>
    %67 = vector.broadcast %66 : vector<8x1xf32> to vector<8x16xf32>
    %68 = arith.mulf %63, %67 : vector<8x16xf32>
    %cst_37 = arith.constant dense<0.000000e+00> : vector<8x8xf32>
    %69 = tpu.matmul %68, %57, %cst_37 {dimension_numbers = #tpu.dot_dimension_numbers<[1], [0], [0], [1], [0, 0, 1, 1], [], []>} : vector<8x16xf32>, vector<16x8xf32>, vector<8x8xf32> -> vector<8x8xf32>
    %c0_38 = arith.constant 0 : index
    %c16 = arith.constant 16 : index
    %70 = vector.load %arg13[%c0_38, %c16] : memref<8x32xf32, #tpu.memory_space<vmem>>, vector<8x8xf32>
    tpu.vector_store %arg13[%c0_38, %c16], %69 {strides = array<i32>} : memref<8x32xf32, #tpu.memory_space<vmem>>, vector<8x8xf32>,
    %71 = vector.extract_strided_slice %22 {offsets = [0, 24], sizes = [8, 8], strides = [1, 1]} : vector<8x32xf32> to vector<8x8xf32>
    %72 = vector.extract_strided_slice %15 {offsets = [0, 24], sizes = [16, 8], strides = [1, 1]} : vector<16x32xf32> to vector<16x8xf32>
    %73 = vector.extract_strided_slice %20 {offsets = [0, 24], sizes = [16, 8], strides = [1, 1]} : vector<16x32xf32> to vector<16x8xf32>
    %cst_39 = arith.constant dense<0.000000e+00> : vector<8x16xf32>
    %74 = tpu.matmul %71, %72, %cst_39 {dimension_numbers = #tpu.dot_dimension_numbers<[1], [1], [0], [0], [0, 0, 1, 0], [], []>} : vector<8x8xf32>, vector<16x8xf32>, vector<8x16xf32> -> vector<8x16xf32>
    %cst_40 = arith.constant dense<0xFF800000> : vector<8xf32>
    %75 = vector.multi_reduction <maximumf>, %74, %cst_40 [1] : vector<8x16xf32> to vector<8xf32>
    %76 = vector.shape_cast %75 : vector<8xf32> to vector<8x1xf32>
    %77 = vector.broadcast %76 : vector<8x1xf32> to vector<8x16xf32>
    %78 = arith.subf %74, %77 : vector<8x16xf32>
    %79 = math.exp %78 : vector<8x16xf32>
    %cst_41 = arith.constant dense<0.000000e+00> : vector<8xf32>
    %80 = vector.multi_reduction <add>, %79, %cst_41 [1] : vector<8x16xf32> to vector<8xf32>
    %81 = vector.shape_cast %80 : vector<8xf32> to vector<8x1xf32>
    %82 = tpu.reciprocal %81 {approx = true} : vector<8x1xf32> -> vector<8x1xf32>
    %83 = vector.broadcast %82 : vector<8x1xf32> to vector<8x16xf32>
    %84 = arith.mulf %79, %83 : vector<8x16xf32>
    %cst_42 = arith.constant dense<0.000000e+00> : vector<8x8xf32>
    %85 = tpu.matmul %84, %73, %cst_42 {dimension_numbers = #tpu.dot_dimension_numbers<[1], [0], [0], [1], [0, 0, 1, 1], [], []>} : vector<8x16xf32>, vector<16x8xf32>, vector<8x8xf32> -> vector<8x8xf32>
    %c0_43 = arith.constant 0 : index
    %c24 = arith.constant 24 : index
    %86 = vector.load %arg13[%c0_43, %c24] : memref<8x32xf32, #tpu.memory_space<vmem>>, vector<8x8xf32>
    tpu.vector_store %arg13[%c0_43, %c24], %85 {strides = array<i32>} : memref<8x32xf32, #tpu.memory_space<vmem>>, vector<8x8xf32>,
    %c0_44 = arith.constant 0 : index
    %c0_45 = arith.constant 0 : index
    %87 = vector.load %arg13[%c0_44, %c0_45] : memref<8x32xf32, #tpu.memory_space<vmem>>, vector<8x32xf32>
    %c0_46 = arith.constant 0 : index
    %c0_47 = arith.constant 0 : index
    %88 = vector.load %arg10[%c0_46, %c0_47] : memref<32x32xf32, #tpu.memory_space<vmem>>, vector<32x32xf32>
    %cst_48 = arith.constant dense<0.000000e+00> : vector<8x32xf32>
    %89 = tpu.matmul %87, %88, %cst_48 {dimension_numbers = #tpu.dot_dimension_numbers<[1], [0], [0], [1], [0, 0, 1, 1], [], []>} : vector<8x32xf32>, vector<32x32xf32>, vector<8x32xf32> -> vector<8x32xf32>
    %c0_49 = arith.constant 0 : index
    %c0_50 = arith.constant 0 : index
    %90 = vector.load %arg11[%c0_49, %c0_50] : memref<1x32xf32, #tpu.memory_space<vmem>>, vector<1x32xf32>
    %91 = vector.broadcast %90 : vector<1x32xf32> to vector<8x32xf32>
    %92 = arith.addf %89, %91 : vector<8x32xf32>
    %c0_51 = arith.constant 0 : index
    %c0_52 = arith.constant 0 : index
    %c0_53 = arith.constant 0 : index
    %93 = vector.load %arg12[%c0_51, %c0_52, %c0_53] : memref<1x8x32xf32, #tpu.memory_space<vmem>>, vector<1x8x32xf32>
    %94 = vector.shape_cast %93 : vector<1x8x32xf32> to vector<8x32xf32>
    %95 = vector.shape_cast %92 : vector<8x32xf32> to vector<1x8x32xf32>
    tpu.vector_store %arg12[%c0_51, %c0_52, %c0_53], %95 {strides = array<i32>} : memref<1x8x32xf32, #tpu.memory_space<vmem>>, vector<1x8x32xf32>,
    return
  }
  func.func @transform_0(%arg0: i32) -> (i32, i32, i32) {
    %c0_i32 = arith.constant 0 : i32
    %c0_i32_0 = arith.constant 0 : i32
    %c0_i32_1 = arith.constant 0 : i32
    return %arg0, %c0_i32, %c0_i32_0 : i32, i32, i32
  }
  func.func @transform_1(%arg0: i32) -> (i32, i32, i32) {
    %c0_i32 = arith.constant 0 : i32
    %c0_i32_0 = arith.constant 0 : i32
    %c0_i32_1 = arith.constant 0 : i32
    return %arg0, %c0_i32, %c0_i32_0 : i32, i32, i32
  }
  func.func @transform_2(%arg0: i32) -> (i32, i32, i32) {
    %c0_i32 = arith.constant 0 : i32
    %c0_i32_0 = arith.constant 0 : i32
    %c0_i32_1 = arith.constant 0 : i32
    return %arg0, %c0_i32, %c0_i32_0 : i32, i32, i32
  }
  func.func @transform_3(%arg0: i32) -> (i32, i32) {
    %c0_i32 = arith.constant 0 : i32
    %c0_i32_0 = arith.constant 0 : i32
    %c0_i32_1 = arith.constant 0 : i32
    return %c0_i32, %c0_i32_0 : i32, i32
  }
  func.func @transform_4(%arg0: i32) -> (i32, i32) {
    %c0_i32 = arith.constant 0 : i32
    %c0_i32_0 = arith.constant 0 : i32
    %c0_i32_1 = arith.constant 0 : i32
    return %c0_i32, %c0_i32_0 : i32, i32
  }
  func.func @transform_5(%arg0: i32) -> (i32, i32) {
    %c0_i32 = arith.constant 0 : i32
    %c0_i32_0 = arith.constant 0 : i32
    %c0_i32_1 = arith.constant 0 : i32
    return %c0_i32, %c0_i32_0 : i32, i32
  }
  func.func @transform_6(%arg0: i32) -> (i32, i32) {
    %c0_i32 = arith.constant 0 : i32
    %c0_i32_0 = arith.constant 0 : i32
    %c0_i32_1 = arith.constant 0 : i32
    return %c0_i32, %c0_i32_0 : i32, i32
  }
  func.func @transform_7(%arg0: i32) -> (i32, i32) {
    %c0_i32 = arith.constant 0 : i32
    %c0_i32_0 = arith.constant 0 : i32
    %c0_i32_1 = arith.constant 0 : i32
    return %c0_i32, %c0_i32_0 : i32, i32
  }
  func.func @transform_8(%arg0: i32) -> (i32, i32) {
    %c0_i32 = arith.constant 0 : i32
    %c0_i32_0 = arith.constant 0 : i32
    %c0_i32_1 = arith.constant 0 : i32
    return %c0_i32, %c0_i32_0 : i32, i32
  }
  func.func @transform_9(%arg0: i32) -> (i32, i32) {
    %c0_i32 = arith.constant 0 : i32
    %c0_i32_0 = arith.constant 0 : i32
    %c0_i32_1 = arith.constant 0 : i32
    return %c0_i32, %c0_i32_0 : i32, i32
  }
  func.func @transform_10(%arg0: i32) -> (i32, i32) {
    %c0_i32 = arith.constant 0 : i32
    %c0_i32_0 = arith.constant 0 : i32
    %c0_i32_1 = arith.constant 0 : i32
    return %c0_i32, %c0_i32_0 : i32, i32
  }
  func.func @transform_11(%arg0: i32) -> (i32, i32, i32) {
    %c0_i32 = arith.constant 0 : i32
    %c0_i32_0 = arith.constant 0 : i32
    %c0_i32_1 = arith.constant 0 : i32
    return %arg0, %c0_i32, %c0_i32_0 : i32, i32, i32
  }
}

</mosaic_0001>

<bundles_post_ra>
// kernel: tpu_custom_call.1
= control target key start
LH: loop header
LB: loop body
LE: loop exit
PB: predicated region body
PF: predicated region fallthrough
CT: control target
= control target key end

     0   :  { %s3021_s0 = inlined_call_operand.hbm [shape: f32[2,8,32], index: 0, kind: input, shape index: {}]   ;;  %s3022_s1 = inlined_call_operand.hbm [shape: f32[2,16,32], index: 1, kind: input, shape index: {}]   ;;  %s3023_s2 = inlined_call_operand.hbm [shape: f32[2,16,32], index: 2, kind: input, shape index: {}]   ;;  %s3024_s3 = inlined_call_operand.hbm [shape: f32[32,32], index: 3, kind: input, shape index: {}]   ;;  %s3025_s4 = inlined_call_operand.vmem [shape: f32[1,32], index: 4, kind: input, shape index: {}]   ;;  %s3026_s5 = inlined_call_operand.hbm [shape: f32[32,32], index: 5, kind: input, shape index: {}]   ;;  %s3027_s6 = inlined_call_operand.vmem [shape: f32[1,32], index: 6, kind: input, shape index: {}]   ;;  %s3028_s7 = inlined_call_operand.hbm [shape: f32[32,32], index: 7, kind: input, shape index: {}]   ;;  %s3029_s8 = inlined_call_operand.hbm [shape: f32[1,32], index: 8, kind: input, shape index: {}]   ;;  %s3030_s9 = inlined_call_operand.vmem [shape: f32[32,32], index: 9, kind: input, shape index: {}]   ;;  %s3031_s10 = inlined_call_operand.vmem [shape: f32[1,32], index: 10, kind: input, shape index: {}]   ;;  %s3032_s11 = inlined_call_operand.hbm [shape: f32[2,8,32], index: 11, kind: output, shape index: {}]  }
   0x1   :  { %3059 = sst [smem:[#allocation27_spill]] %s3022_s1 }
   0x2   :  { %3060 = sst [smem:[#allocation28_spill]] %s3024_s3 }
   0x3   :  { %3061 = sst [smem:[#allocation29_spill]] %s3025_s4 }
   0x4   :  { %3062 = sst [smem:[#allocation30_spill]] %s3027_s6 }
   0x5   :  { %3063 = sst [smem:[#allocation31_spill]] %s3028_s7 }
   0x6   :  { %3064 = sst [smem:[#allocation32_spill]] %s3030_s9 }
   0x7   :  { %3065 = sst [smem:[#allocation33_spill]] %s3031_s10 }
   0x8   :  { %3066 = sst [smem:[#allocation34_spill]] %s3032_s11 }
   0x9   :  { %16 = vsyncpa [#allocation4], 0 }
   0xa   :  { %18 = vsyncpa [#allocation4 + $0x1], 0 }
   0xb   :  { %19 = vsyncpa [#allocation7], 0 }
   0xc   :  { %21 = vsyncpa [#allocation7 + $0x1], 0 }
   0xd   :  { %22 = vsyncpa [#allocation10], 0 }
   0xe   :  { %23 = vsyncpa [#allocation13], 0 }
   0xf   :  { %24 = vsyncpa [#allocation5], 0 }
  0x10   :  { %26 = vsyncpa [#allocation5 + $0x1], 0  ;;  %s2536_s17 = smov 0   ;;  %s2538_s18 = smov 0  }
  0x11   :  { %s2540_s19 = smov 0   ;;  %s2542_s20 = smov 0  }
  0x12 LB: > { %3067 = sst [smem:[#allocation21_spill]] %s2443_s17  ;;  %s2557_s21 = sadd.s32 4294967295, %s2455_s20   ;;  %s2455_s20 = sphi %s2542_s20, %s3111_s20   ;;  %s2451_s19 = sphi %s2540_s19, %s3113_s19   ;;  %s2447_s18 = sphi %s2538_s18, %s3115_s18   ;;  %s2443_s17 = sphi %s2536_s17, %s3114_s17  }
  0x13   : > { %3068 = sst [smem:[#allocation22_spill]] %s2451_s19  ;;  %s1763_s22 = sadd.s32 4294967294, %s2455_s20  }
  0x14   : > { %p52_p0 = scmp.ne.s32.totalorder %s2447_s18, %s2443_s17  ;;  %p3033_p1 = scmp.eq.s32.totalorder %s2557_s21, 0 }
  0x15   : > { %p302_p3 = scmp.eq.s32.totalorder %s1763_s22, 1  ;;  %p1764_p5 = scmp.ge.s32.totalorder %s2455_s20, 1 }
  0x16   : > { %p2566_p4 = por %p3033_p1, %p52_p0  ;;  %p309_p7 = scmp.lt.s32.totalorder %s2455_s20, 3 }
  0x17   : > { %p2571_p6 = por %p302_p3, %p52_p0  ;;  %s2457_s26 = smov [#allocation9]  }
  0x18   : > { %s3069_s23 = scalar_select %p2566_p4, 1, 0 }
  0x19   : > { %s3070_s24 = scalar_select %p2571_p6, 1, 0 }
  0x1a   : > { %p2576_p8 = pnand %p1764_p5, %p309_p7  ;;  %s321_s27 = sshll.u32 %s2457_s26, 4  ;;  %s2580_s27 = int_to_ptr.vmem [resolvable:$true] %s321_s27 }
  0x1b   : > { %3071 = sst [smem:[#allocation23_spill]] %s3070_s24  ;;  %s2458_s29 = smov [#allocation12]  }
  0x1c   : > { %s3072_s25 = scalar_select %p2576_p8, 1, 0 }
  0x1d   : > { %p2045_p9 = pneg %p2576_p8  ;;  %s353_s30 = sshll.u32 %s2458_s29, 4  ;;  %s2591_s30 = int_to_ptr.vmem [resolvable:$true] %s353_s30 }
  0x1e   : > { %s3074_s3 = sld [smem:[#allocation28_spill]] }
  0x1f   : > { %p2587_p11 = pnand %p2045_p9, %p3033_p1 }
  0x21   : > { %s3073_s28 = scalar_select %p2587_p11, 1, 0 }
  0x22   : > { %p2601_p13 = pneg %p2587_p11 }
  0x24   : > { %s2175_s14 = scalar_lea.hbm %s3074_s3, 512 }
  0x25   : > { %p2176_p12 = scmp.ne.s32.totalorder %s3074_s3, %s2175_s14  ;;  %p2182_p5 = scmp.lt.u32.totalorder %s2175_s14, %s3074_s3 }
  0x26   : > { %s3075_s22 = scalar_select %p2601_p13, 1, 0 }
  0x27   : > { %p2178_p0 = pnand %p2601_p13, %p2176_p12 }
  0x29   : > { %p2179_p3 = pneg %p2178_p0 }
  0x2b   : > { %p2184_p7 = pnand %p2182_p5, %p2179_p3 }
  0x2d   : > { %2187 = shalt.err (!%p2184_p7)
}
  0x2e   : > { %s2188_s12 = scalar_lea.vmem %s2580_s27, 512  ;;  %p2196_p2 = scmp.lt.s32.totalorder %s2580_s27, %s2580_s27 }
  0x2f   : > { %p2189_p9 = scmp.ne.s32.totalorder %s2580_s27, %s2188_s12  ;;  %p2197_p6 = scmp.lt.s32.totalorder %s2188_s12, %s2188_s12 }
  0x31   : > { %p2191_p10 = pnand %p2189_p9, %p2601_p13  ;;  %p2198_p12 = por %p2197_p6, %p2196_p2 }
  0x33   : > { %p2192_p1 = pneg %p2191_p10 }
  0x35   : > { %p2199_p0 = pnand %p2198_p12, %p2192_p1 }
  0x37   : > { %2202 = shalt.err (!%p2199_p0)
}
  0x38   : > { %s3037_s13 = smov 128   ;;  %s3039_s14 = smov 8  }
  0x39   : > { %2048 = dma.hbm_to_vmem [thread:$0]  (!%p2587_p11), %s3074_s3, 512, %s2580_s27, [#allocation10], %s3037_s13, %s3037_s13, %s3039_s14  }
  0x3a   : > { %s3076_s7 = sld [smem:[#allocation31_spill]] }
  0x40   : > { %s2203_s12 = scalar_lea.hbm %s3076_s7, 512 }
  0x41   : > { %p2204_p1 = scmp.ne.s32.totalorder %s3076_s7, %s2203_s12  ;;  %p2210_p10 = scmp.lt.u32.totalorder %s2203_s12, %s3076_s7 }
  0x43   : > { %p2206_p2 = pnand %p2204_p1, %p2601_p13 }
  0x45   : > { %p2207_p6 = pneg %p2206_p2 }
  0x47   : > { %p2212_p3 = pnand %p2210_p10, %p2207_p6 }
  0x49   : > { %2215 = shalt.err (!%p2212_p3)
}
  0x4a   : > { %s2216_s27 = scalar_lea.vmem %s2591_s30, 512  ;;  %p2224_p12 = scmp.lt.s32.totalorder %s2591_s30, %s2591_s30 }
  0x4b   : > { %p2217_p5 = scmp.ne.s32.totalorder %s2591_s30, %s2216_s27  ;;  %p2225_p0 = scmp.lt.s32.totalorder %s2216_s27, %s2216_s27 }
  0x4d   : > { %p2219_p7 = pnand %p2217_p5, %p2601_p13  ;;  %p2226_p1 = por %p2225_p0, %p2224_p12 }
  0x4f   : > { %p2220_p9 = pneg %p2219_p7 }
  0x51   : > { %p2227_p2 = pnand %p2226_p1, %p2220_p9 }
  0x53   : > { %2230 = shalt.err (!%p2227_p2)
}
  0x54   : > { %2054 = dma.hbm_to_vmem [thread:$0]  (!%p2587_p11), %s3076_s7, 512, %s2591_s30, [#allocation13], %s3037_s13, %s3037_s13, %s3039_s14  }
  0x55   : > { %s2652_s17 = sadd.s32 1, %s2455_s20   ;;  %s39_s24 = sadd.s32 1, %s2451_s19 }
  0x56   : > { %3077 = sst [smem:[#allocation24_spill]] %s2652_s17  ;;  %s36_s15 = ssub.s32 %s2455_s20, %s2652_s17 }
  0x57   : > { %p46_p6 = scmp.ne.s32.totalorder %s2451_s19, %s2447_s18  ;;  %p37_p10 = scmp.eq.s32.totalorder %s36_s15, 0 }
  0x58   : > { %p47_p3 = scmp.eq.s32.totalorder %s2455_s20, 0  ;;  %p3078_p5 = scmp.eq.s32.totalorder %s2557_s21, 1 }
  0x59   : > { %p2076_p9 = scmp.lt.s32.totalorder %s2455_s20, 2  ;;  %s2671_s29 = sand.u32 1, %s2451_s19  }
  0x5a   : > { %p2662_p7 = por %p3078_p5, %p46_p6  ;;  %p48_p12 = por %p47_p3, %p46_p6 }
  0x5b   : > { %s2668_s26 = scalar_select %p37_p10, %s2451_s19, %s39_s24  }
  0x5c   : > { %s3079_s16 = scalar_select %p2662_p7, 1, 0 }
  0x5d   : > { %3081 = sst [smem:[#allocation26_spill]] %s2668_s26  ;;  %s402_s30 = sand.u32 1, %s2455_s20  }
  0x5e   : > { %3080 = sst [smem:[#allocation25_spill]] %s3079_s16  ;;  %s3044_s12 = sshll.u32 %s2671_s29, 4 }
  0x5f   : > { %p2675_p0 = pnand %p2076_p9, %p48_p12  ;;  %s1817_s10 = sshll.u32 %s2455_s20, 8 }
  0x60   : > { %s3083_s1 = sld [smem:[#allocation27_spill]]  ;;  %s406_s24 = scalar_lea.vmem [#allocation6], %s3044_s12 }
  0x61   : > { %s3082_s27 = scalar_select %p2675_p0, 1, 0 }
  0x62   : > { %s413_s14 = sshll.u32 %s406_s24, 4  ;;  %s2692_s26 = scalar_lea.hbm %s3023_s2, %s1817_s10  ;;  %s2687_s14 = int_to_ptr.vmem [resolvable:$true] %s413_s14 }
  0x63   : > { %s2694_s19 = scalar_lea.sflag [#allocation7], %s402_s30  ;;  %p2700_p2 = pneg %p2675_p0 }
  0x65   : > { %s3084_s11 = scalar_select %p2700_p2, 1, 0 }
  0x66   : > { %s2683_s13 = scalar_lea.hbm %s3083_s1, %s1817_s10  ;;  %s2236_s12 = scalar_lea.hbm %s3083_s1, 512 }
  0x67   : > { %s2231_s17 = scalar_lea.hbm %s2683_s13, 256  ;;  %p2237_p3 = scmp.lt.u32.totalorder %s2683_s13, %s3083_s1 }
  0x68   : > { %p2232_p1 = scmp.ne.s32.totalorder %s2683_s13, %s2231_s17  ;;  %p2238_p5 = scmp.lt.u32.totalorder %s2236_s12, %s2231_s17 }
  0x69   : > { %p2240_p12 = scmp.lt.u32.totalorder %s2231_s17, %s2683_s13 }
  0x6a   : > { %p2234_p6 = pnand %p2700_p2, %p2232_p1  ;;  %p2239_p9 = por %p2238_p5, %p2237_p3 }
  0x6c   : > { %p2235_p10 = pneg %p2234_p6  ;;  %p2241_p7 = por %p2240_p12, %p2239_p9 }
  0x6e   : > { %p2242_p4 = pnand %p2241_p7, %p2235_p10 }
  0x70   : > { %2245 = shalt.err (!%p2242_p4)
}
  0x71   : > { %s2246_s30 = scalar_lea.vmem %s2687_s14, 256  ;;  %s2461_s10 = smov [#allocation6]  }
  0x72   : > { %p2247_p1 = scmp.ne.s32.totalorder %s2687_s14, %s2246_s30  ;;  %s2251_s15 = sshll.u32 %s2461_s10, 4  ;;  %s2252_s15 = int_to_ptr.vmem [resolvable:$false] %s2251_s15 }
  0x73   : > { %s2253_s24 = scalar_lea.vmem %s2252_s15, 512  ;;  %p2254_p11 = scmp.lt.s32.totalorder %s2687_s14, %s2252_s15 }
  0x74   : > { %p2249_p6 = pnand %p2247_p1, %p2700_p2  ;;  %p2255_p13 = scmp.lt.s32.totalorder %s2253_s24, %s2246_s30 }
  0x76   : > { %p2250_p8 = pneg %p2249_p6  ;;  %p2256_p3 = por %p2255_p13, %p2254_p11 }
  0x78   : > { %p2257_p5 = pnand %p2256_p3, %p2250_p8 }
  0x7a   : > { %2260 = shalt.err (!%p2257_p5)
}
  0x7b   : > { %s3085_s17 = smov 8   ;;  %s3086_s12 = smov 128  }
  0x7c   : > { %2064 = dma.hbm_to_vmem [thread:$0]  (!%p2675_p0), %s2683_s13, 256, %s2687_s14, %s2694_s19, %s3086_s12, %s3086_s12, %s3085_s17  }
  0x7d   : > { %s3087_s3 = sshll.u32 %s2671_s29, 4  ;;  %s2462_s30 = smov [#allocation11]  }
  0x7e   : > { %s427_s7 = scalar_lea.vmem [#allocation8], %s3087_s3  ;;  %s337_s15 = sshll.u32 %s2462_s30, 4  ;;  %s338_s15 = int_to_ptr.vmem [resolvable:$true] %s337_s15 }
  0x7f   : > { %s434_s10 = sshll.u32 %s427_s7, 4  ;;  %s2261_s16 = scalar_lea.hbm %s3026_s5, 512  ;;  %s2729_s10 = int_to_ptr.vmem [resolvable:$true] %s434_s10 }
  0x80   : > { %p2262_p4 = scmp.ne.s32.totalorder %s3026_s5, %s2261_s16  ;;  %p3088_p8 = scmp.ne.s32.totalorder %s3075_s22, 0 }
  0x81   : > { %p2268_p7 = scmp.lt.u32.totalorder %s2261_s16, %s3026_s5 }
  0x82   : > { %p2264_p11 = pnand %p2262_p4, %p3088_p8 }
  0x84   : > { %p2265_p13 = pneg %p2264_p11 }
  0x86   : > { %p2270_p10 = pnand %p2268_p7, %p2265_p13 }
  0x88   : > { %2273 = shalt.err (!%p2270_p10)
}
  0x89   : > { %s2274_s3 = scalar_lea.vmem %s338_s15, 512  ;;  %p2282_p6 = scmp.lt.s32.totalorder %s338_s15, %s338_s15 }
  0x8a   : > { %p2275_p9 = scmp.ne.s32.totalorder %s338_s15, %s2274_s3  ;;  %p2283_p3 = scmp.lt.s32.totalorder %s2274_s3, %s2274_s3 }
  0x8c   : > { %p2277_p12 = pnand %p2275_p9, %p3088_p8  ;;  %p2284_p5 = por %p2283_p3, %p2282_p6 }
  0x8e   : > { %p2278_p1 = pneg %p2277_p12 }
  0x90   : > { %p2285_p0 = pnand %p2284_p5, %p2278_p1 }
  0x92   : > { %2288 = shalt.err (!%p2285_p0)
}
  0x93   : > { %p3089_p4 = scmp.ne.s32.totalorder %s3073_s28, 0  ;;  %s2463_s9 = smov [#allocation14]  }
  0x94   : > { %s367_s16 = sshll.u32 %s2463_s9, 4  ;;  %s1770_s7 = sshll.u32 %s2671_s29, 3  ;;  %s368_s16 = int_to_ptr.vmem [resolvable:$true] %s367_s16 }
  0x95   : > { %2051 = dma.hbm_to_vmem [thread:$0]  (!%p3089_p4), %s3026_s5, 512, %s338_s15, [#allocation10], %s3086_s12, %s3086_s12, %s3085_s17  }
  0x96   : > { %s2289_s13 = scalar_lea.hbm %s3029_s8, 16 }
  0x97   : > { %p2290_p0 = scmp.ne.s32.totalorder %s3029_s8, %s2289_s13  ;;  %p2296_p7 = scmp.lt.u32.totalorder %s2289_s13, %s3029_s8 }
  0x99   : > { %p2292_p11 = pnand %p2290_p0, %p3088_p8 }
  0x9b   : > { %p2293_p13 = pneg %p2292_p11 }
  0x9d   : > { %p2298_p10 = pnand %p2296_p7, %p2293_p13 }
  0x9f   : > { %2301 = shalt.err (!%p2298_p10)
}
  0xa0   : > { %s2302_s15 = scalar_lea.vmem %s368_s16, 16  ;;  %s2309_s4 = scalar_lea.vmem %s368_s16, 32 }
  0xa1   : > { %p2303_p9 = scmp.ne.s32.totalorder %s368_s16, %s2302_s15  ;;  %p2310_p6 = scmp.lt.s32.totalorder %s368_s16, %s368_s16 }
  0xa2   : > { %p2311_p3 = scmp.lt.s32.totalorder %s2309_s4, %s2302_s15 }
  0xa3   : > { %p2305_p12 = pnand %p2303_p9, %p3088_p8 }
  0xa4   : > { %p2312_p5 = por %p2311_p3, %p2310_p6 }
  0xa5   : > { %p2306_p1 = pneg %p2305_p12 }
  0xa7   : > { %p2313_p2 = pnand %p2312_p5, %p2306_p1 }
  0xa9   : > { %2316 = shalt.err (!%p2313_p2)
}
  0xaa   : > { %2057 = dma.hbm_to_vmem [thread:$0]  (!%p3089_p4), %s3029_s8, 16, %s368_s16, [#allocation13]  }
  0xab   : > { %s1771_s6 = sshll.u32 %s2455_s20, 7  ;;  %s388_s14 = scalar_lea.vmem [#allocation3], %s1770_s7 }
  0xac   : > { %s2775_s13 = scalar_lea.hbm %s3021_s0, %s1771_s6  ;;  %s395_s3 = sshll.u32 %s388_s14, 4  ;;  %s396_s3 = int_to_ptr.vmem [resolvable:$true] %s395_s3 }
  0xad   : > { %s385_s28 = scalar_lea.sflag [#allocation4], %s2671_s29  ;;  %s2317_s1 = scalar_lea.hbm %s2775_s13, 128 }
  0xae   : > { %p2318_p2 = scmp.ne.s32.totalorder %s2775_s13, %s2317_s1  ;;  %p3090_p8 = scmp.ne.s32.totalorder %s3084_s11, 0 }
  0xaf   : > { %s2322_s4 = scalar_lea.hbm %s3021_s0, 256  ;;  %p2323_p4 = scmp.lt.u32.totalorder %s2775_s13, %s3021_s0 }
  0xb0   : > { %p2320_p0 = pnand %p2318_p2, %p3090_p8  ;;  %p2324_p13 = scmp.lt.u32.totalorder %s2322_s4, %s2317_s1 }
  0xb1   : > { %p2326_p10 = scmp.lt.u32.totalorder %s2317_s1, %s2775_s13 }
  0xb2   : > { %p2321_p11 = pneg %p2320_p0  ;;  %p2325_p7 = por %p2324_p13, %p2323_p4 }
  0xb4   : > { %p2327_p9 = por %p2326_p10, %p2325_p7 }
  0xb6   : > { %p2328_p12 = pnand %p2327_p9, %p2321_p11 }
  0xb8   : > { %2331 = shalt.err (!%p2328_p12)
}
  0xb9   : > { %s2332_s29 = scalar_lea.vmem %s396_s3, 128  ;;  %s2464_s7 = smov [#allocation3]  }
  0xba   : > { %p2333_p1 = scmp.ne.s32.totalorder %s396_s3, %s2332_s29  ;;  %s2337_s6 = sshll.u32 %s2464_s7, 4  ;;  %s2338_s6 = int_to_ptr.vmem [resolvable:$false] %s2337_s6 }
  0xbb   : > { %s2339_s24 = scalar_lea.vmem %s2338_s6, 256  ;;  %p2340_p5 = scmp.lt.s32.totalorder %s396_s3, %s2338_s6 }
  0xbc   : > { %p2335_p6 = pnand %p2333_p1, %p3090_p8  ;;  %p2341_p2 = scmp.lt.s32.totalorder %s2339_s24, %s2332_s29 }
  0xbe   : > { %p2336_p3 = pneg %p2335_p6  ;;  %p2342_p0 = por %p2341_p2, %p2340_p5 }
  0xc0   : > { %p2343_p4 = pnand %p2342_p0, %p2336_p3 }
  0xc2   : > { %2346 = shalt.err (!%p2343_p4)
}
  0xc3   : > { %p3091_p13 = scmp.ne.s32.totalorder %s3082_s27, 0  ;;  %s2347_s22 = scalar_lea.hbm %s2692_s26, 256 }
  0xc4   : > { %p2348_p11 = scmp.ne.s32.totalorder %s2692_s26, %s2347_s22  ;;  %s2352_s16 = scalar_lea.hbm %s3023_s2, 512 }
  0xc5   : > { %2061 = dma.hbm_to_vmem [thread:$0]  (!%p3091_p13), %s2775_s13, 128, %s396_s3, %s385_s28  }
  0xc6   : > { %p2350_p7 = pnand %p2348_p11, %p3090_p8  ;;  %p2353_p9 = scmp.lt.u32.totalorder %s2692_s26, %s3023_s2 }
  0xc7   : > { %p2354_p12 = scmp.lt.u32.totalorder %s2352_s16, %s2347_s22  ;;  %p2356_p6 = scmp.lt.u32.totalorder %s2347_s22, %s2692_s26 }
  0xc8   : > { %p2351_p10 = pneg %p2350_p7 }
  0xc9   : > { %p2355_p1 = por %p2354_p12, %p2353_p9 }
  0xcb   : > { %p2357_p3 = por %p2356_p6, %p2355_p1 }
  0xcd   : > { %p2358_p5 = pnand %p2357_p3, %p2351_p10 }
  0xcf   : > { %2361 = shalt.err (!%p2358_p5)
}
  0xd0   : > { %s2362_s13 = scalar_lea.vmem %s2729_s10, 256  ;;  %s2465_s3 = smov [#allocation8]  }
  0xd1   : > { %p2363_p2 = scmp.ne.s32.totalorder %s2729_s10, %s2362_s13  ;;  %s2367_s28 = sshll.u32 %s2465_s3, 4  ;;  %s2368_s28 = int_to_ptr.vmem [resolvable:$false] %s2367_s28 }
  0xd2   : > { %s2369_s9 = scalar_lea.vmem %s2368_s28, 512  ;;  %p2370_p11 = scmp.lt.s32.totalorder %s2729_s10, %s2368_s28 }
  0xd3   : > { %p2365_p0 = pnand %p2363_p2, %p3090_p8  ;;  %p2371_p7 = scmp.lt.s32.totalorder %s2369_s9, %s2362_s13 }
  0xd5   : > { %p2366_p4 = pneg %p2365_p0  ;;  %p2372_p9 = por %p2371_p7, %p2370_p11 }
  0xd7   : > { %p2373_p12 = pnand %p2372_p9, %p2366_p4 }
  0xd9   : > { %2376 = shalt.err (!%p2373_p12)
}
  0xda   : > { %2067 = dma.hbm_to_vmem [thread:$0]  (!%p3091_p13), %s2692_s26, 256, %s2729_s10, %s2694_s19, %s3086_s12, %s3086_s12, %s3085_s17  }
  0xdb   : > { %p3092_p8 = scmp.ne.s32.totalorder %s3072_s25, 0 }
  0xdc   : > { %s2823_s11 = sand.u32 (!%p3092_p8), 1, %s2447_s18   ;;  %p3093_p10 = scmp.ne.s32.totalorder (!%p3092_p8), %s3069_s23, 0 }
  0xdd   : > { %446 = sbr.rel (%p3092_p8) target bundleno = 3166 (0xc5e), region = 64  ;;  %s1779_s30 = sshll.u32 (!%p3092_p8), %s2823_s11, 3 }
  0xde   : > { %s449_s29 = scalar_lea.sflag (!%p3092_p8), [#allocation4], %s2823_s11  ;;  %s2829_s27 = scalar_lea.vmem (!%p3092_p8), [#allocation3], %s1779_s30 }
  0xe4   : > { %2422 = dma.done.wait (%p3093_p10), %s449_s29, 128  }
  0xe5   : > { %2424 = vsyncadd (%p3093_p10), %s449_s29, 4294967168  ;;  %s457_s19 = sand.u32 1, %s2557_s21   ;;  %s1780_s25 = sshll.u32 %s2823_s11, 4 }
  0xe6   : > { %s458_s26 = scalar_lea.sflag [#allocation7], %s457_s19  ;;  %s2837_s17 = scalar_lea.vmem [#allocation6], %s1780_s25 }
  0xe7   : > { %2426 = dma.done.wait (%p3093_p10), %s458_s26, 512  }
  0xe8   : > { %2428 = vsyncadd (%p3093_p10), %s458_s26, 4294966784  ;;  %s2843_s12 = scalar_lea.vmem [#allocation8], %s1780_s25  ;;  %p3094_p13 = scmp.eq.s32.totalorder %s2557_s21, 0 }
  0xea   : > { %2430 = dma.done.wait (%p3094_p13), [#allocation10], 1024   ;;  %p3095_p1 = pmov %p3094_p13 }
  0xec   : > { %2432 = vsyncadd (%p3095_p1), [#allocation10], 4294966272  ;;  %p3096_p6 = pmov %p3095_p1 }
  0xed   : > { %p3097_p3 = pmov %p3095_p1 }
  0xee   : > { %2434 = dma.done.wait (%p3096_p6), [#allocation13], 528  }
  0xef   : > { %2436 = vsyncadd (%p3097_p3), [#allocation13], 4294966768  ;;  %v2466_v0 = vmov 0.0|0.0   ;;  %vm2467_vm0 = vmmov 0   ;;  %v2468_v1 = vmov 0.0   ;;  %vm551_vm1 = vcmask 261120  }
  0xf0   : > { %1965 = vmatprep.subr.bf16.mxu0 %v2466_v0  ;;  %1873 = vmatprep.mubr.msk.f32.mxu0 %vm2467_vm0, %v2468_v1  ;;  %v625_v2 = vld [vmem:[#allocation11] sm:$0xff]  ;;  %v626_v3 = vld [vmem:[#allocation11 + $0x8] sm:$0xff]  ;;  %v627_v4 = vld [vmem:[#allocation11 + $0x10] sm:$0xff]  ;;  %s3098_s7 = sld [smem:[#allocation30_spill]]  ;;  %s3099_s22 = sld [smem:[#allocation29_spill]]  ;;  %vm810_vm2 = vcmask 64512  }
  0xf1   : > { %v1971_v5 = vpack.c.bf16 %v626_v3, %v625_v2  ;;  %v628_v6 = vld [vmem:[#allocation11 + $0x18] sm:$0xff]  ;;  %v536_v7 = vld [vmem:[%s2837_s17] sm:$0xff]  ;;  %v541_v10 = vld [vmem:[#allocation9 + $0x8] sm:$0xff]  ;;  %s2469_s14 = smov 120   ;;  %vm890_vm4 = vcmask 130048   ;;  %s2470_s1 = smov 112  }
  0xf2   : > { %v540_v8 = vld [vmem:[#allocation9] sm:$0xff]  ;;  %v1975_v9 = vpack.c.bf16 %v628_v6, %v627_v4  ;;  %1884 = vmatprep.mubr.msk.f32.mxu1 %vm551_vm1, %v536_v7  ;;  %v542_v11 = vld [vmem:[#allocation9 + $0x10] sm:$0xff]  ;;  %v543_v13 = vld [vmem:[#allocation9 + $0x18] sm:$0xff]  ;;  %s2471_s16 = smov 104   ;;  %s2472_s15 = smov 8   ;;  %vm1154_vm5 = vcmask 130112  }
  0xf3   : > { %1972 = vmatprep.subr.bf16.mxu1 %v1971_v5  ;;  %v1966_v12 = vpack.c.bf16 %v541_v10, %v540_v8  ;;  %v1969_v14 = vpack.c.bf16 %v543_v13, %v542_v11  ;;  %v537_v15 = vld [vmem:[%s2837_s17 + $0x8] sm:$0xff]  ;;  %vm2874_vm3 = vmpackc.low %vm810_vm2, %vm810_vm2  ;;  %v717_v30 = vld [vmem:[#allocation12] sm:$0xff]  ;;  %s2473_s4 = smov 16   ;;  %vm1332_vm6 = vcmask 195712   ;;  %s3102_s28 = sld [smem:[#allocation32_spill]]  ;;  %vm1510_vm7 = vcmask 261312  }
  0xf4   : > { %1974 = vmatpush3.bf16.msra.mxu1 %v1971_v5  ;;  %v535_v16 = vld [vmem:[%s2829_s27] sm:$0xff]  ;;  %v718_v31 = vld [vmem:[#allocation12 + $0x8] sm:$0xff]  ;;  %v538_v35 = vld [vmem:[%s2843_s12] sm:$0xff]  ;;  %s2474_s17 = smov 24   ;;  %s1814_s6 = sshll.u32 %s2557_s21, 7 }
  0xf5   : > { %1976 = vmatprep.subr.bf16.mxu1 %v1975_v9  ;;  %1967 = vmatpush3.bf16.msra.mxu0 %v1966_v12  ;;  %v719_v32 = vld [vmem:[#allocation12 + $0x10] sm:$0xff]  ;;  %v1979_v33 = vpack.c.bf16 %v718_v31, %v717_v30  ;;  %v720_v34 = vld [vmem:[#allocation12 + $0x18] sm:$0xff]  ;;  %v1792_v48 = vld [vmem:[#allocation14] ss:$0 sm:$0xff]  ;;  %s534_s24 = scalar_lea.vmem [#allocation15], %s1779_s30  ;;  %s2475_s30 = smov [#allocation15]  }
  0xf6   : > { %1968 = vmatprep.subr.bf16.mxu0 %v2466_v0  ;;  %v1789_v17 = vld [vmem:[%s3098_s7] ss:$0 sm:$0xff]  ;;  %v1983_v36 = vpack.c.bf16 %v720_v34, %v719_v32  ;;  %s3104_s7 = sld [smem:[#allocation33_spill]]  ;;  %s2381_s13 = sshll.u32 %s2475_s30, 4  ;;  %s2382_s13 = int_to_ptr.vmem [resolvable:$false] %s2381_s13 }
  0xf7   : > { %v1787_v18 = vld [vmem:[%s3099_s22] ss:$0 sm:$0xff]  ;;  %s1612_s22 = sshll.u32 %s534_s24, 4  ;;  %s2383_s3 = scalar_lea.vmem %s2382_s13, 256  ;;  %s2978_s22 = int_to_ptr.vmem [resolvable:$true] %s1612_s22 }
  0xf8   : > { %1978 = vmatpush3.bf16.msra.mxu1 %v1975_v9  ;;  %v539_v37 = vld [vmem:[%s2843_s12 + $0x8] sm:$0xff]  ;;  %s3103_s12 = sld [smem:[#allocation25_spill]]  ;;  %s2377_s21 = scalar_lea.vmem %s2978_s22, 128 }
  0xf9   : > { %1970 = vmatpush3.bf16.msra.mxu0 %v1969_v14  ;;  %1987 = vmatprep.subr.bf16.mxu1 %v2466_v0  ;;  %p2378_p5 = scmp.ne.s32.totalorder %s2978_s22, %s2377_s21  ;;  %p2384_p11 = scmp.lt.s32.totalorder %s2978_s22, %s2382_s13 }
  0xfa   : > { %1980 = vmatprep.subr.bf16.mxu0 %v1979_v33  ;;  %p2385_p7 = scmp.lt.s32.totalorder %s2383_s3, %s2377_s21 }
  0xfb   : > { %1885 = vmatmul.mubr.msk.f32.vlgmr.msra.gmra.mrb[0].mxu1 %vm551_vm1, %v537_v15 }
  0xfc   : > { %1874 = vmatmul.mubr.msk.f32.vlgmr.msra.gmra.mrb[0].mxu0 %vm551_vm1, %v535_v16  ;;  %1902 = vmatprep.mubr.msk.f32.mxu1 %vm2467_vm0, %v2468_v1  ;;  %p2386_p9 = por %p2385_p7, %p2384_p11 }
  0xfd   : > { %1895 = vmatprep.mubr.msk.f32.mxu0 %vm551_vm1, %v538_v35  ;;  %1982 = vmatpush3.bf16.msra.mxu0 %v1979_v33 }
  0xfe   : > { %1984 = vmatprep.subr.bf16.mxu0 %v1983_v36  ;;  %p3106_p2 = scmp.ne.s32.totalorder %s3103_s12, 0 }
 0x100   : > { %p2379_p0 = pnand %p2378_p5, %p3106_p2 }
 0x101   : > { %1986 = vmatpush3.bf16.msra.mxu0 %v1983_v36 }
 0x102   : > { %1998 = vmatprep.subr.bf16.mxu0 %v2466_v0  ;;  %p2380_p4 = pneg %p2379_p0 }
 0x104   : > { %1896 = vmatmul.mubr.msk.f32.vlgmr.msra.gmra.mrb[2].mxu0 %vm551_vm1, %v539_v37  ;;  %p2387_p12 = pnand %p2386_p9, %p2380_p4 }
 0x105   : > { %1923 = vmatprep.mubr.msk.f32.mxu0 %vm2467_vm0, %v2468_v1 }
 0x1ce   : > { %v1886_v19 = vpop.f32.mrb[0].mxu1 }
 0x1cf   : > { %v714_v20 = vadd.f32 %v1886_v19, %v1789_v17  ;;  %v708_v21 = vpop.f32.mrb[1].mxu1  ;;  %v621_v22 = vpop.f32.mrb[0].mxu0 }
 0x1d0   : > { %v709_v23 = vadd.f32 %v1789_v17, %v708_v21  ;;  %v622_v24 = vadd.f32 %v1787_v18, %v621_v22  ;;  %v1875_v25 = vpop.f32.mrb[1].mxu0 }
 0x1d2   : > { %v1988_v27 = vpack.c.bf16 %v714_v20, %v709_v23  ;;  %v2878_v28 = vpack.i.bf16 %v714_v20, %v709_v23  ;;  %v2884_v29 = vmul.f32 0.35355338, %v622_v24 }
 0x1d4   : > { %2130 = vrot.lane.b32.xlu1 %v2878_v28, %s2469_s14  ;;  %1990 = vmatpush3.bf16.xpose.msk.msra.mxu1 %vm2874_vm3, %v1988_v27 }
 0x1d5   : > { %1991 = vmatprep.subr.bf16.mxu1 %v2466_v0 }
 0x1d7   : > { %v1897_v41 = vpop.f32.mrb[2].mxu0 }
 0x1d8   : > { %976 = vrot.lane.b32.xlu1 %v2884_v29, %s2469_s14  ;;  %v800_v42 = vpop.f32.mrb[3].mxu0  ;;  %v806_v49 = vadd.f32 %v1897_v41, %v1792_v48 }
 0x1d9   : > { %v801_v50 = vadd.f32 %v1792_v48, %v800_v42 }
 0x1db   : > { %1903 = vmatmul.mubr.msk.f32.vlgmr.msra.gmra.mrb[2].mxu1 %vm810_vm2, %v2884_v29  ;;  %v1992_v51 = vpack.c.bf16 %v806_v49, %v801_v50  ;;  %v2902_v52 = vpack.i.bf16 %v806_v49, %v801_v50 }
 0x1dc   : > { %1909 = vmatprep.mubr.msk.f32.mxu1 %vm2467_vm0, %v2468_v1 }
 0x1dd   : > { %1993 = vmatpush3.bf16.msra.mxu1 %v1992_v51 }
 0x1de   : > { %1994 = vmatprep.subr.bf16.mxu1 %v2466_v0 }
 0x246   : > { %v2131_v54 = vpop.permute.xlu1 %2130 }
 0x247   : > { %v2133_v55 = vunpack.i.h.bf16 %v2131_v54  ;;  %v2132_v56 = vunpack.i.l.bf16 %v2131_v54 }
 0x249   : > { %v1995_v59 = vpack.c.bf16 %v2133_v55, %v2132_v56 }
 0x24a   : > { %v977_v60 = vpop.permute.xlu1 %976 }
 0x2ae   : > { %v886_v38 = vpop.f32.mrb[2].mxu1 }
 0x2af   : > { %v1904_v39 = vpop.f32.mrb[3].mxu1  ;;  %v891_v40 = vsel %vm890_vm4, %v886_v38, -inf }
 0x2b0   : > { %892 = vmax.xlane.f32.xlu0 %v891_v40 }
 0x33d   : > { %v893_v43 = vpop.xlane.xlu0 %892 }
 0x33e   : > { %v894_v44 = vsub.f32 %v886_v38, %v893_v43 }
 0x340   : > { %v895_v45 = vmul.f32 1.442695, %v894_v44 }
 0x342   : > { %2159 = vpow2.f32 %v895_v45 }
 0x34c   : > { %v2160_v46 = vpop.eup %2159 }
 0x34d   : > { %v897_v47 = vsel %vm890_vm4, %v2160_v46, 0.0 }
 0x34e   : > { %898 = vadd.xlane.f32.xlu0 %v897_v47 }
 0x3db   : > { %v899_v53 = vpop.xlane.xlu0 %898 }
 0x3dc   : > { %2161 = vrcp.f32 %v899_v53 }
 0x3e6   : > { %v2162_v57 = vpop.eup %2161 }
 0x3e7   : > { %v901_v58 = vmul.f32 %v2162_v57, %v2160_v46 }
 0x3e9   : > { %1910 = vmatmul.mubr.msk.f32.vlgmr.msra.gmra.mrb[4].mxu1 %vm890_vm4, %v901_v58 }
 0x3ea   : > { %1997 = vmatpush3.bf16.xpose.msk.msra.mxu1 %vm2874_vm3, %v1995_v59  ;;  %1916 = vmatprep.mubr.msk.f32.mxu1 %vm2467_vm0, %v2468_v1 }
 0x3eb   : > { %2005 = vmatprep.subr.bf16.mxu1 %v2466_v0 }
 0x3f1   : > { %1917 = vmatmul.mubr.msk.f32.vlgmr.msra.gmra.mrb[6].mxu1 %vm810_vm2, %v977_v60 }
 0x3f2   : > { %1937 = vmatprep.mubr.msk.f32.mxu1 %vm2467_vm0, %v2468_v1 }
 0x4bc   : > { %v971_v61 = vpop.f32.mrb[4].mxu1 }
 0x4bd   : > { %975 = vst.msk [vmem:[#allocation2] sm:$0xff] %vm810_vm2, %v971_v61  ;;  %v1911_v62 = vpop.f32.mrb[5].mxu1 }
 0x4be   : > { %v1513_v62 = vld [vmem:[%s3102_s28] sm:$0xff] }
 0x4c4   : > { %v1054_v63 = vpop.f32.mrb[6].mxu1 }
 0x4c5   : > { %v1918_v2 = vpop.f32.mrb[7].mxu1  ;;  %v1058_v3 = vsel %vm890_vm4, %v1054_v63, -inf }
 0x4c6   : > { %1059 = vmax.xlane.f32.xlu0 %v1058_v3  ;;  %v1515_v3 = vld [vmem:[%s3102_s28 + $0x10] sm:$0xff] }
 0x4dc   : > { %2135 = vrot.lane.b32.xlu0 %v2902_v52, %s2469_s14 }
 0x4e0   : > { %2140 = vrot.lane.b32.xlu0 %v2878_v28, %s2470_s1 }
 0x4e4   : > { %1156 = vrot.lane.b32.xlu0 %v2884_v29, %s2470_s1 }
 0x553   : > { %v1060_v4 = vpop.xlane.xlu0 %1059 }
 0x554   : > { %v1061_v5 = vsub.f32 %v1054_v63, %v1060_v4  ;;  %v1514_v63 = vld [vmem:[%s3102_s28 + $0x8] sm:$0xff]  ;;  %v1516_v4 = vld [vmem:[%s3102_s28 + $0x18] sm:$0xff] }
 0x555   : > { %v2016_v2 = vpack.c.bf16 %v1514_v63, %v1513_v62 }
 0x556   : > { %v1062_v6 = vmul.f32 1.442695, %v1061_v5 }
 0x557   : > { %v2136_v7 = vpop.permute.xlu0 %2135 }
 0x558   : > { %2163 = vpow2.f32 %v1062_v6  ;;  %v2138_v8 = vunpack.i.h.bf16 %v2136_v7  ;;  %v2137_v9 = vunpack.i.l.bf16 %v2136_v7 }
 0x55a   : > { %v1999_v10 = vpack.c.bf16 %v2138_v8, %v2137_v9  ;;  %v1811_v9 = vld [vmem:[%s3104_s7] ss:$0 sm:$0xff] }
 0x55b   : > { %v2141_v17 = vpop.permute.xlu0 %2140 }
 0x55c   : > { %2000 = vmatpush3.bf16.msra.mxu0 %v1999_v10  ;;  %v2143_v19 = vunpack.i.h.bf16 %v2141_v17  ;;  %v2142_v20 = vunpack.i.l.bf16 %v2141_v17 }
 0x55d   : > { %2001 = vmatprep.subr.bf16.mxu0 %v2466_v0 }
 0x55e   : > { %v2002_v23 = vpack.c.bf16 %v2143_v19, %v2142_v20 }
 0x55f   : > { %v1157_v24 = vpop.permute.xlu0 %1156 }
 0x562   : > { %v2164_v11 = vpop.eup %2163 }
 0x563   : > { %v1064_v12 = vsel %vm890_vm4, %v2164_v11, 0.0 }
 0x564   : > { %1065 = vadd.xlane.f32.xlu1 %v1064_v12 }
 0x575   : > { %2145 = vrot.lane.b32.xlu1 %v2902_v52, %s2470_s1 }
 0x579   : > { %2150 = vrot.lane.b32.xlu1 %v2878_v28, %s2471_s16 }
 0x5f1   : > { %v1066_v13 = vpop.xlane.xlu1 %1065 }
 0x5f2   : > { %2165 = vrcp.f32 %v1066_v13 }
 0x5f5   : > { %v2146_v14 = vpop.permute.xlu1 %2145 }
 0x5f6   : > { %v2148_v15 = vunpack.i.h.bf16 %v2146_v14  ;;  %v2147_v16 = vunpack.i.l.bf16 %v2146_v14 }
 0x5f8   : > { %v2006_v18 = vpack.c.bf16 %v2148_v15, %v2147_v16 }
 0x5f9   : > { %v2151_v37 = vpop.permute.xlu1 %2150 }
 0x5fa   : > { %2007 = vmatpush3.bf16.msra.mxu1 %v2006_v18  ;;  %v2153_v39 = vunpack.i.h.bf16 %v2151_v37  ;;  %v2152_v40 = vunpack.i.l.bf16 %v2151_v37 }
 0x5fb   : > { %2008 = vmatprep.subr.bf16.mxu1 %v2466_v0 }
 0x5fc   : > { %v2166_v21 = vpop.eup %2165  ;;  %v2009_v43 = vpack.c.bf16 %v2153_v39, %v2152_v40 }
 0x5fd   : > { %v1068_v22 = vmul.f32 %v2166_v21, %v2164_v11 }
 0x5ff   : > { %1924 = vmatmul.mubr.msk.f32.vlgmr.msra.gmra.mrb[4].mxu0 %vm890_vm4, %v1068_v22 }
 0x600   : > { %2004 = vmatpush3.bf16.xpose.msk.msra.mxu0 %vm2874_vm3, %v2002_v23  ;;  %1930 = vmatprep.mubr.msk.f32.mxu0 %vm2467_vm0, %v2468_v1 }
 0x601   : > { %2012 = vmatprep.subr.bf16.mxu0 %v2466_v0 }
 0x607   : > { %1931 = vmatmul.mubr.msk.f32.vlgmr.msra.gmra.mrb[6].mxu0 %vm810_vm2, %v1157_v24 }
 0x608   : > { %1951 = vmatprep.mubr.msk.f32.mxu0 %vm2467_vm0, %v2468_v1 }
 0x6d2   : > { %v1146_v25 = vpop.f32.mrb[4].mxu0 }
 0x6d3   : > { %v1925_v27 = vpop.f32.mrb[5].mxu0 }
 0x6da   : > { %v1234_v28 = vpop.f32.mrb[6].mxu0 }
 0x6db   : > { %v1932_v30 = vpop.f32.mrb[7].mxu0  ;;  %v1238_v31 = vsel %vm890_vm4, %v1234_v28, -inf }
 0x6dc   : > { %1239 = vmax.xlane.f32.xlu0 %v1238_v31 }
 0x769   : > { %v1240_v32 = vpop.xlane.xlu0 %1239 }
 0x76a   : > { %v1241_v33 = vsub.f32 %v1234_v28, %v1240_v32 }
 0x76c   : > { %v1242_v34 = vmul.f32 1.442695, %v1241_v33 }
 0x76e   : > { %2167 = vpow2.f32 %v1242_v34 }
 0x778   : > { %v2168_v35 = vpop.eup %2167 }
 0x779   : > { %v1244_v36 = vsel %vm890_vm4, %v2168_v35, 0.0 }
 0x77a   : > { %1245 = vadd.xlane.f32.xlu1 %v1244_v36 }
 0x78b   : > { %1334 = vrot.lane.b32.xlu1 %v2884_v29, %s2471_s16 }
 0x807   : > { %v1246_v38 = vpop.xlane.xlu1 %1245 }
 0x808   : > { %2169 = vrcp.f32 %v1246_v38 }
 0x80b   : > { %v1335_v44 = vpop.permute.xlu1 %1334 }
 0x812   : > { %v2170_v41 = vpop.eup %2169 }
 0x813   : > { %v1248_v42 = vmul.f32 %v2170_v41, %v2168_v35 }
 0x815   : > { %1938 = vmatmul.mubr.msk.f32.vlgmr.msra.gmra.mrb[8].mxu1 %vm890_vm4, %v1248_v42 }
 0x816   : > { %2011 = vmatpush3.bf16.xpose.msk.msra.mxu1 %vm2874_vm3, %v2009_v43  ;;  %1944 = vmatprep.mubr.msk.f32.mxu1 %vm2467_vm0, %v2468_v1 }
 0x81d   : > { %1945 = vmatmul.mubr.msk.f32.vlgmr.msra.gmra.mrb[10].mxu1 %vm810_vm2, %v1335_v44 }
 0x8e8   : > { %v1324_v29 = vpop.f32.mrb[8].mxu1 }
 0x8e9   : > { %v1939_v45 = vpop.f32.mrb[9].mxu1 }
 0x8f0   : > { %v1412_v46 = vpop.f32.mrb[10].mxu1 }
 0x8f1   : > { %v1946_v47 = vpop.f32.mrb[11].mxu1  ;;  %v1416_v48 = vsel %vm890_vm4, %v1412_v46, -inf }
 0x8f2   : > { %1417 = vmax.xlane.f32.xlu0 %v1416_v48 }
 0x908   : > { %2155 = vrot.lane.b32.xlu0 %v2902_v52, %s2471_s16  ;;  %s3105_s16 = sld [smem:[#allocation34_spill]] }
 0x90c   : > { %1151 = vrot.lane.b32.xlu0 %v1146_v25, %s2472_s15 }
 0x90e   : > { %s2976_s15 = scalar_lea.hbm %s3105_s16, %s1814_s6 }
 0x910   : > { %1329 = vrot.lane.b32.xlu0 %v1324_v29, %s2473_s4  ;;  %s1599_s4 = scalar_lea.sflag [#allocation5], %s2823_s11 }
 0x97f   : > { %v1418_v26 = vpop.xlane.xlu0 %1417 }
 0x980   : > { %v1419_v49 = vsub.f32 %v1412_v46, %v1418_v26 }
 0x982   : > { %v1420_v50 = vmul.f32 1.442695, %v1419_v49 }
 0x983   : > { %v2156_v51 = vpop.permute.xlu0 %2155 }
 0x984   : > { %2171 = vpow2.f32 %v1420_v50  ;;  %v2158_v53 = vunpack.i.h.bf16 %v2156_v51  ;;  %v2157_v54 = vunpack.i.l.bf16 %v2156_v51 }
 0x986   : > { %v2013_v55 = vpack.c.bf16 %v2158_v53, %v2157_v54 }
 0x987   : > { %v1152_v56 = vpop.permute.xlu0 %1151 }
 0x988   : > { %1155 = vst.msk [vmem:[#allocation2] sm:$0xff] %vm1154_vm5, %v1152_v56  ;;  %2014 = vmatpush3.bf16.msra.mxu0 %v2013_v55 }
 0x989   : > { %2015 = vmatprep.subr.bf16.mxu0 %v2466_v0 }
 0x98b   : > { %v1330_v52 = vpop.permute.xlu0 %1329 }
 0x98c   : > { %1333 = vst.msk [vmem:[#allocation2] sm:$0xff] %vm1332_vm6, %v1330_v52 }
 0x98e   : > { %v2172_v57 = vpop.eup %2171 }
 0x98f   : > { %v1422_v58 = vsel %vm890_vm4, %v2172_v57, 0.0 }
 0x990   : > { %1423 = vadd.xlane.f32.xlu1 %v1422_v58 }
 0xa1d   : > { %v1424_v59 = vpop.xlane.xlu1 %1423 }
 0xa1e   : > { %2173 = vrcp.f32 %v1424_v59 }
 0xa28   : > { %v2174_v60 = vpop.eup %2173 }
 0xa29   : > { %v1426_v61 = vmul.f32 %v2174_v60, %v2172_v57 }
 0xa2b   : > { %1952 = vmatmul.mubr.msk.f32.vlgmr.msra.gmra.mrb[8].mxu0 %vm890_vm4, %v1426_v61 }
 0xa2c   : > { %1962 = vmatprep.mubr.msk.f32.mxu0 %vm2467_vm0, %v2468_v1  ;;  %2017 = vmatpush3.bf16.msra.mxu0 %v2016_v2  ;;  %v2019_v1 = vpack.c.bf16 %v1516_v4, %v1515_v3 }
 0xa2d   : > { %2018 = vmatprep.subr.bf16.mxu0 %v2466_v0 }
 0xa30   : > { %2020 = vmatpush3.bf16.msra.mxu0 %v2019_v1 }
 0xafe   : > { %v1502_v5 = vpop.f32.mrb[8].mxu0 }
 0xaff   : > { %1507 = vrot.lane.b32.xlu0 %v1502_v5, %s2474_s17  ;;  %v1953_v6 = vpop.f32.mrb[9].mxu0 }
 0xb71   : > { %v1508_v7 = vpop.permute.xlu0 %1507 }
 0xb72   : > { %1511 = vst.msk [vmem:[#allocation2] sm:$0xff] %vm1510_vm7, %v1508_v7 }
 0xb79   : > { %v1512_v8 = vld [vmem:[#allocation2] sm:$0xff] }
 0xb7a   : > { %1963 = vmatmul.mubr.msk.f32.vlgmr.msra.gmra.mrb[10].mxu0 %vm551_vm1, %v1512_v8 }
 0xc4d   : > { %v1593_v0 = vpop.f32.mrb[10].mxu0 }
 0xc4e   : > { %v1594_v10 = vadd.f32 %v1811_v9, %v1593_v0  ;;  %v1964_v11 = vpop.f32.mrb[11].mxu0 }
 0xc50   : > { %1597 = vst.msk [vmem:[%s534_s24] sm:$0xff] %vm551_vm1, %v1594_v10 }
 0xc51   : > { %2390 = shalt.err (!%p2387_p12)
}
 0xc52   : > { %s2391_s11 = scalar_lea.hbm %s2976_s15, 128  ;;  %s2395_s27 = scalar_lea.hbm %s3105_s16, 256 }
 0xc53   : > { %p2392_p8 = scmp.ne.s32.totalorder %s2976_s15, %s2391_s11  ;;  %p2396_p1 = scmp.lt.u32.totalorder %s2976_s15, %s3105_s16 }
 0xc54   : > { %p2397_p6 = scmp.lt.u32.totalorder %s2395_s27, %s2391_s11  ;;  %p2399_p5 = scmp.lt.u32.totalorder %s2391_s11, %s2976_s15 }
 0xc55   : > { %p2393_p10 = pnand %p2392_p8, %p3106_p2 }
 0xc56   : > { %p2398_p3 = por %p2397_p6, %p2396_p1 }
 0xc57   : > { %p2394_p13 = pneg %p2393_p10 }
 0xc58   : > { %p2400_p0 = por %p2399_p5, %p2398_p3 }
 0xc5a   : > { %p2401_p4 = pnand %p2400_p0, %p2394_p13 }
 0xc5c   : > { %2404 = shalt.err (!%p2401_p4)
}
 0xc5d   : > { %2043 = dma.vmem_to_hbm [thread:$0]  (%p3106_p2), %s2978_s22, 128, %s2976_s15, %s1599_s4  }
 0xc5e PF: > { %s3107_s26 = sld [smem:[#allocation21_spill]]  ;;  %s3108_s17 = sld [smem:[#allocation23_spill]] }
 0xc5f   : > { %p3110_p7 = scmp.ge.s32.totalorder %s2455_s20, 2 }
 0xc64   : > { %s1624_s23 = sand.u32 1, %s3107_s26   ;;  %p3109_p11 = scmp.ne.s32.totalorder %s3108_s17, 0 }
 0xc65   : > { %s1625_s10 = scalar_lea.sflag [#allocation5], %s1624_s23 }
 0xc66   : > { %p2069_p9 = pnand %p3110_p7, %p3109_p11 }
 0xc68   : > { %2438 = dma.done.wait (!%p2069_p9), %s1625_s10, 128  }
 0xc69   : > { %2440 = vsyncadd (!%p2069_p9), %s1625_s10, 4294967168  ;;  %s3111_s20 = sld [smem:[#allocation24_spill]]  ;;  %s3112_s7 = sld [smem:[#allocation22_spill]] }
 0xc6a   : > { %s3113_s19 = sld [smem:[#allocation26_spill]]  ;;  %s3114_s17 = smov %s2447_s18 }
 0xc6f   : > { %p29_p12 = scmp.ge.s32.totalorder %s3111_s20, 4   ;;  %s3115_s18 = smov %s3112_s7 }
 0xc71   :  { %31 = sbr.rel (!%p29_p12) target bundleno = 18 (0x12), region = 149 }
 0xc78   :  { %1630 = vsyncpa [#allocation4], 1 }
 0xc79   :  { %1632 = vsyncpa [#allocation4 + $0x1], 1 }
 0xc7a   :  { %1633 = vsyncpa [#allocation7], 1 }
 0xc7b   :  { %1635 = vsyncpa [#allocation7 + $0x1], 1 }
 0xc7c   :  { %1636 = vsyncpa [#allocation10], 1 }
 0xc7d   :  { %1637 = vsyncpa [#allocation13], 1 }
 0xc7e   :  { %1638 = vsyncpa [#allocation5], 1 }
 0xc7f   :  { %1640 = vsyncpa [#allocation5 + $0x1], 1 }

</bundles_post_ra>
